<compile_context>
chip_gen: v6e
topology: v6e:2x2x1
jax: 0.10.0
libtpu: 0.0.40
codegen_flags: <defaults>
</compile_context>

<pallas_src>
import math

import jax
import jax.numpy as jnp
from jax import lax
from jax.experimental import pallas as pl
from jax.experimental.pallas import tpu as pltpu


# ----------------------------- glue (plain JAX) ------------------------------

def _unfold_nchw(x, kernel_size, stride, padding, feature_pad=0):
    """torch.nn.functional.unfold equivalent for NCHW input.

    Returns (B, C*k*k + feature_pad, L) with PyTorch feature ordering
    (c*k*k + ki*k + kj) and L iterating row-major over output positions.
    The trailing `feature_pad` zero rows (the q*b padding of the torch module)
    are folded into the same producer so no extra HBM pass is needed.
    """
    B, C, H, W = x.shape
    k, s, p = kernel_size, stride, padding
    xp = jnp.pad(x, ((0, 0), (0, 0), (p, p), (p, p)))
    H_out = (H + 2 * p - k) // s + 1
    W_out = (W + 2 * p - k) // s + 1
    cols = []
    for ki in range(k):
        for kj in range(k):
            patch = xp[:, :, ki:ki + s * H_out:s, kj:kj + s * W_out:s]
            cols.append(patch.reshape(B, C, H_out * W_out))
    cols = jnp.stack(cols, axis=2).reshape(B, C * k * k, H_out * W_out)
    if feature_pad:
        zeros = jnp.zeros((B, feature_pad, H_out * W_out), cols.dtype)
        cols = jnp.concatenate([cols, zeros], axis=1)
    return cols, H_out, W_out


def _expand_block_circulant_T(w):
    """w: (p, q, b) -> W_T: (p*b, q*b) with
       W_T[pi*b + j, qi*b + kk] = w[pi, qi, (j - kk) % b]
    so that  out[n, m] = sum_k W_T[n, k] * x[m, k]  matches the FFT path."""
    p, q, b = w.shape
    j = jnp.arange(b)[:, None]
    kk = jnp.arange(b)[None, :]
    idx = (j - kk) % b                                   # (b_j, b_kk)
    circ = w[:, :, idx]                                  # (p, q, b_j, b_kk)
    circ = jnp.transpose(circ, (0, 2, 1, 3))             # (p, b_j, q, b_kk)
    return circ.reshape(p * b, q * b)


# ----------------------------- Pallas kernels ---------------------------------

def _make_bc_kernel(num_k_tiles):
    """Build the kernel body.  num_k_tiles == 1: whole-K contraction, direct
    store.  num_k_tiles > 1: f32 VMEM accumulator with pl.when init/finalize."""
    # TODO(synk): audit the Mosaic lowering (pl.lower_as_mlir / bundle dump) for
    # a per-tile vxpose of the large (tm, tk) activation operand in this
    # lhs @ rhs^T contraction; if one appears and the kernel is not firmly
    # MXU-bound, compute the natural (tm, tk) @ (tk, N) product instead and
    # transpose only the much smaller (tm, N) result tile before the store.

    if num_k_tiles == 1:
        def kernel(x_ref, wt_ref, o_ref):
            # x_ref : (tm, K)  compute dtype activation tile
            # wt_ref: (N,  K)  compute dtype, pre-transposed circulant weight
            # o_ref : (F,  tm) output tile, F <= N  (transpose fused via layout)
            res = lax.dot_general(
                wt_ref[...], x_ref[...],
                dimension_numbers=(((1,), (1,)), ((), ())),  # contract K with K
                preferred_element_type=jnp.float32)          # (N, tm) on the MXU
            o_ref[...] = res[: o_ref.shape[0], :].astype(o_ref.dtype)
        return kernel

    def kernel(x_ref, wt_ref, o_ref, acc_ref):
        k = pl.program_id(2)

        @pl.when(k == 0)
        def _init():
            acc_ref[...] = jnp.zeros_like(acc_ref)

        acc_ref[...] += lax.dot_general(
            wt_ref[...], x_ref[...],
            dimension_numbers=(((1,), (1,)), ((), ())),
            preferred_element_type=jnp.float32)

        @pl.when(k == num_k_tiles - 1)
        def _store():
            o_ref[...] = acc_ref[: o_ref.shape[0], :].astype(o_ref.dtype)

    return kernel


# ----------------------------- tiling heuristics -------------------------------

def _vmem_footprint(tm, tk, K, N, in_item, out_item):
    whole_k = (tk == K)
    w_bufs = 1 if whole_k else 2             # resident weight is single-buffered
    acc = 0 if whole_k else N * tm * 4       # f32 K-reduction accumulator scratch
    return (2 * tm * tk * in_item            # double-buffered activation tile
            + w_bufs * N * tk * in_item      # weight buffer(s)
            + 2 * N * tm * out_item          # double-buffered output tile
            + acc)


def _choose_tiles(B, L, K, N, in_item, out_item, vmem_budget, forced_tk=None):
    """Pick (tm, tk).  Prefer the largest row tile that fits the VMEM budget
    while keeping enough grid steps to occupy both v7x TensorCores and the DMA
    pipeline; prefer whole-K residency, but K-tile (with accumulator) rather
    than shrink tm below what the budget allows.  tk must divide K exactly."""
    L_cap = pl.cdiv(max(L, 1), 128) * 128
    tm_cands = [t for t in (4096, 2048, 1024, 512, 256, 128)
                if t <= max(128, L_cap)]
    if forced_tk is not None:
        assert K % forced_tk == 0, "k_tile must divide q*block_size"
        tk_cands = [forced_tk]
    else:
        tk_cands = [K] + [t for t in (2048, 1024, 512, 256, 128)
                          if t < K and K % t == 0]

    for min_steps in (8, 4, 2, 1):
        for tm in tm_cands:                  # largest row tile first
            if min_steps > 1 and B * pl.cdiv(L, tm) < min_steps:
                continue
            for tk in tk_cands:              # whole-K first, then largest tile
                if _vmem_footprint(tm, tk, K, N, in_item, out_item) <= vmem_budget:
                    return tm, tk
    return 128, tk_cands[-1]


# ----------------------------- pallas_call wrapper -----------------------------

def _circulant_matmul(x_blk, w_t, out_features, *, tm, tk, out_dtype, vmem_limit):
    """x_blk: (B, L, K), w_t: (N, K)  ->  (B, out_features, L) in out_dtype."""
    B, L, K = x_blk.shape
    N, K2 = w_t.shape
    assert K == K2 and K % tk == 0
    F = out_features
    nl = pl.cdiv(L, tm)
    nk = K // tk
    grid = (B, nl, nk)
    in_item = x_blk.dtype.itemsize
    out_item = jnp.dtype(out_dtype).itemsize

    if nk == 1:
        # Whole-K resident weight: block index never changes, so a second
        # pipeline buffer is pure VMEM waste -> single-buffer it.
        w_spec = pl.BlockSpec((N, K), lambda b, l, k: (0, 0),
                              pipeline_mode=pl.Buffered(1))
        scratch = []
        weight_hbm_bytes = N * K * in_item
    else:
        w_spec = pl.BlockSpec((N, tk), lambda b, l, k: (0, k))
        scratch = [pltpu.VMEM((N, tm), jnp.float32)]
        weight_hbm_bytes = B * nl * N * K * in_item   # re-streamed per (b, l)

    # Advisory: flops use N = p*b (true MXU work, every row is computed);
    # bytes_accessed uses F = out_features (true HBM writeback).
    cost = pl.CostEstimate(
        flops=int(2 * B * L * K * N),
        transcendentals=0,
        bytes_accessed=int(B * L * K * in_item + weight_hbm_bytes
                           + B * F * L * out_item))

    return pl.pallas_call(
        _make_bc_kernel(nk),
        out_shape=jax.ShapeDtypeStruct((B, F, L), out_dtype),
        grid_spec=pltpu.PrefetchScalarGridSpec(
            num_scalar_prefetch=0,
            grid=grid,
            in_specs=[
                # (1, tm, tk) activation tile, batch dim squeezed out
                pl.BlockSpec((None, tm, tk), lambda b, l, k: (b, l, k)),
                w_spec,
            ],
            # fused output transpose: lane-dense (F, tm) stores into (B, F, L)
            out_specs=pl.BlockSpec((None, F, tm), lambda b, l, k: (b, 0, l)),
            scratch_shapes=scratch),
        compiler_params=pltpu.CompilerParams(
            dimension_semantics=("parallel", "parallel", "arbitrary"),
            vmem_limit_bytes=int(vmem_limit)),
        cost_estimate=cost,
    )(x_blk, w_t)


# ----------------------------- forward wrapper ---------------------------------

def block_circulant_conv(x, weight, *, kernel_size, stride, block_size,
                         out_features, compute_dtype=jnp.bfloat16,
                         out_dtype=None, k_tile=None):
    B, C, H, W = x.shape
    in_features = kernel_size * kernel_size * C
    p, q, b = weight.shape
    assert b == block_size
    assert q * b >= in_features and p * b >= out_features
    if out_dtype is None:
        out_dtype = compute_dtype

    # im2col glue (plain JAX).  Cast to the compute dtype *before* the unfold so
    # the k*k-blown-up intermediate is half the HBM bytes; the q*b feature
    # padding is folded into the unfold output (no separate pad pass).
    xc = x.astype(compute_dtype)
    K = q * block_size
    x_unf, H_out, W_out = _unfold_nchw(
        xc, kernel_size, stride, kernel_size // 2, feature_pad=K - in_features)
    L = H_out * W_out

    # PyTorch quirk: raw row-major reshape of (B, q*b, L) into rows of length
    # q*b (features and spatial positions interleaved per row).  A row never
    # crosses a batch boundary, so grouping rows by batch as (B, L, q*b) is a
    # free bitcast reshape with identical semantics.
    x_blk = x_unf.reshape(B, L, K)

    w_t = _expand_block_circulant_T(weight).astype(compute_dtype)   # (p*b, q*b)
    N = p * block_size

    in_item = jnp.dtype(compute_dtype).itemsize
    out_item = jnp.dtype(out_dtype).itemsize

    # Generation-aware VMEM budget: v7x has 64 MiB per TensorCore, v5e/v6e 128.
    try:
        vmem_cap = int(pltpu.get_tpu_info().vmem_capacity_bytes)
    except Exception:
        vmem_cap = 64 << 20                     # conservative (v7x-sized) fallback
    budget = (40 << 20) if vmem_cap <= (64 << 20) else (56 << 20)

    tm, tk = _choose_tiles(B, L, K, N, in_item, out_item, budget, forced_tk=k_tile)
    footprint = _vmem_footprint(tm, tk, K, N, in_item, out_item)
    # Explicit scoped-VMEM limit: footprint + generous headroom for Mosaic
    # internal scratch and (8,128)-tile padding, clamped to physical VMEM.
    vmem_limit = int(min(vmem_cap - (4 << 20),
                         max(2 * footprint, footprint + (8 << 20))))

    out = _circulant_matmul(x_blk, w_t, out_features, tm=tm, tk=tk,
                            out_dtype=out_dtype, vmem_limit=vmem_limit)
    return out.reshape(B, out_features, H_out, W_out)


# ----------------------------- reference & init --------------------------------

def _fft_reference(x, weight, *, kernel_size, stride, out_features):
    """Mirror of the torch rfft/irfft forward (plain JAX, float32)."""
    p, q, b = weight.shape
    B, C = x.shape[0], x.shape[1]
    in_features = kernel_size * kernel_size * C
    x_unf, H_out, W_out = _unfold_nchw(
        x.astype(jnp.float32), kernel_size, stride, kernel_size // 2,
        feature_pad=q * b - in_features)
    xr = x_unf.reshape(-1, q, b)                  # same raw row-major reshape
    xf = jnp.fft.rfft(xr)
    wf = jnp.fft.rfft(weight.astype(jnp.float32))
    hf = jnp.sum(xf[:, None, :, :] * wf[None, :, :, :], axis=2)
    h = jnp.fft.irfft(hf, n=b)
    h = h.reshape(-1, p * b)[:, :out_features]
    h = h.reshape(B, H_out * W_out, out_features)
    return jnp.transpose(h, (0, 2, 1)).reshape(B, out_features, H_out, W_out)


def _xavier_uniform(key, p, q, b):
    bound = math.sqrt(6.0 / (q * b + p * b))
    return jax.random.uniform(key, (p, q, b), jnp.float32, -bound, bound)


# ----------------------------- main / check ------------------------------------

if __name__ == "__main__":
    key = jax.random.PRNGKey(0)
    k1, k2, k3, k4 = jax.random.split(key, 4)

    # ---- config 1: small module-consistent shapes (whole-K resident path) ----
    B, C, H, W = 2, 4, 16, 16
    kernel_size, stride, block_size, out_features = 3, 1, 8, 12
    in_features = kernel_size * kernel_size * C                               # 36
    q = -(-in_features // block_size)                                         # 5
    p = -(-out_features // block_size)                                        # 2

    x = jax.random.normal(k1, (B, C, H, W), dtype=jnp.float32)
    w = _xavier_uniform(k2, p, q, block_size)

    ref = _fft_reference(x, w, kernel_size=kernel_size, stride=stride,
                         out_features=out_features)

    # f32 compute path: tight check of the circulant-matmul kernel math.
    out_f32 = jax.block_until_ready(block_circulant_conv(
        x, w, kernel_size=kernel_size, stride=stride, block_size=block_size,
        out_features=out_features, compute_dtype=jnp.float32))
    assert out_f32.shape == (B, out_features, H // stride, W // stride)
    assert jnp.allclose(out_f32, ref, atol=1e-3, rtol=1e-3), (
        float(jnp.max(jnp.abs(out_f32 - ref))))

    # default path: bf16 streaming + bf16 output, f32 MXU accumulation.
    # (loose tolerance: input, weight and output are all bf16-quantized)
    out_bf16 = jax.block_until_ready(block_circulant_conv(
        x, w, kernel_size=kernel_size, stride=stride, block_size=block_size,
        out_features=out_features))
    assert out_bf16.shape == (B, out_features, H // stride, W // stride)
    out_bf16_f = out_bf16.astype(jnp.float32)
    assert jnp.allclose(out_bf16_f, ref, atol=5e-2, rtol=5e-2), (
        float(jnp.max(jnp.abs(out_bf16_f - ref))))

    # ---- config 2: forces the K-tiled accumulator path (nk > 1) ----
    B2, C2, H2, W2 = 1, 256, 16, 16
    ks2, st2, bs2, of2 = 1, 1, 16, 32
    q2 = (ks2 * ks2 * C2) // bs2                                              # 16
    p2 = of2 // bs2                                                           # 2
    x2 = jax.random.normal(k3, (B2, C2, H2, W2), dtype=jnp.float32)
    w2 = _xavier_uniform(k4, p2, q2, bs2)

    ref2 = _fft_reference(x2, w2, kernel_size=ks2, stride=st2, out_features=of2)
    out2 = jax.block_until_ready(block_circulant_conv(
        x2, w2, kernel_size=ks2, stride=st2, block_size=bs2, out_features=of2,
        compute_dtype=jnp.float32, k_tile=128))
    assert out2.shape == (B2, of2, H2 // st2, W2 // st2)
    assert jnp.allclose(out2, ref2, atol=1e-3, rtol=1e-3), (
        float(jnp.max(jnp.abs(out2 - ref2))))

    print("KERNEL_OK")
</pallas_src>

<mosaic_0001>
module attributes {stable_mosaic.version = 11 : i64} {
  func.func @kernel(%arg0: i32, %arg1: i32, %arg2: i32, %arg3: memref<1x128x40xf32, #tpu.memory_space<vmem>>, %arg4: memref<16x40xf32, #tpu.memory_space<vmem>>, %arg5: memref<1x12x128xf32, #tpu.memory_space<vmem>>) attributes {dimension_semantics = [#tpu.dimension_semantics<parallel>, #tpu.dimension_semantics<parallel>, #tpu.dimension_semantics<arbitrary>], iteration_bounds = array<i64: 2, 2, 1>, scalar_prefetch = 0 : i64, scratch_operands = 0 : i64, tpu.core_type = #tpu.core_type<tc>, window_params = [{transform_indices = @transform_0, window_bounds = array<i64: 1, 128, 40>}, {pipeline_mode = #tpu.pipeline_mode<synchronous>, transform_indices = @transform_1, window_bounds = array<i64: 16, 40>}, {transform_indices = @transform_2, window_bounds = array<i64: 1, 12, 128>}]} {
    %c0 = arith.constant 0 : index
    %c0_0 = arith.constant 0 : index
    %0 = vector.load %arg4[%c0, %c0_0] : memref<16x40xf32, #tpu.memory_space<vmem>>, vector<16x40xf32>
    %c0_1 = arith.constant 0 : index
    %c0_2 = arith.constant 0 : index
    %c0_3 = arith.constant 0 : index
    %1 = vector.load %arg3[%c0_1, %c0_2, %c0_3] : memref<1x128x40xf32, #tpu.memory_space<vmem>>, vector<1x128x40xf32>
    %2 = vector.shape_cast %1 : vector<1x128x40xf32> to vector<128x40xf32>
    %cst = arith.constant dense<0.000000e+00> : vector<16x128xf32>
    %3 = tpu.matmul %0, %2, %cst {dimension_numbers = #tpu.dot_dimension_numbers<[1], [1], [0], [0], [0, 0, 1, 0], [], []>} : vector<16x40xf32>, vector<128x40xf32>, vector<16x128xf32> -> vector<16x128xf32>
    %4 = vector.extract_strided_slice %3 {offsets = [0, 0], sizes = [12, 128], strides = [1, 1]} : vector<16x128xf32> to vector<12x128xf32>
    %c0_4 = arith.constant 0 : index
    %c0_5 = arith.constant 0 : index
    %c0_6 = arith.constant 0 : index
    %5 = vector.load %arg5[%c0_4, %c0_5, %c0_6] : memref<1x12x128xf32, #tpu.memory_space<vmem>>, vector<1x12x128xf32>
    %6 = vector.shape_cast %5 : vector<1x12x128xf32> to vector<12x128xf32>
    %7 = vector.shape_cast %4 : vector<12x128xf32> to vector<1x12x128xf32>
    tpu.vector_store %arg5[%c0_4, %c0_5, %c0_6], %7 {strides = array<i32>} : memref<1x12x128xf32, #tpu.memory_space<vmem>>, vector<1x12x128xf32>,
    return
  }
  func.func @transform_0(%arg0: i32, %arg1: i32, %arg2: i32) -> (i32, i32, i32) {
    %c0_i32 = arith.constant 0 : i32
    return %arg0, %arg1, %arg2 : i32, i32, i32
  }
  func.func @transform_1(%arg0: i32, %arg1: i32, %arg2: i32) -> (i32, i32) {
    %c0_i32 = arith.constant 0 : i32
    %c0_i32_0 = arith.constant 0 : i32
    %c0_i32_1 = arith.constant 0 : i32
    return %c0_i32, %c0_i32_0 : i32, i32
  }
  func.func @transform_2(%arg0: i32, %arg1: i32, %arg2: i32) -> (i32, i32, i32) {
    %c0_i32 = arith.constant 0 : i32
    %c0_i32_0 = arith.constant 0 : i32
    return %arg0, %c0_i32, %arg1 : i32, i32, i32
  }
}

</mosaic_0001>

<bundles_post_ra>
// kernel: tpu_custom_call.1
= control target key start
LH: loop header
LB: loop body
LE: loop exit
PB: predicated region body
PF: predicated region fallthrough
CT: control target
= control target key end

     0   :  { %s672_s9 = smov 0   ;;  %s674_s10 = smov 0   ;;  %s824_s0 = inlined_call_operand.vmem [shape: f32[2,256,40], index: 0, kind: input, shape index: {}]   ;;  %s825_s1 = inlined_call_operand.vmem [shape: f32[16,40], index: 1, kind: input, shape index: {}]   ;;  %s826_s2 = inlined_call_operand.vmem [shape: f32[2,12,256], index: 2, kind: output, shape index: {}]  }
   0x1   :  { %s676_s11 = smov 0   ;;  %s678_s12 = smov 0  }
   0x2   :  { %s680_s13 = smov 0   ;;  %s682_s14 = smov 0  }
   0x3   :  { %s684_s15 = smov 0  }
   0x4 LB: > { %s27_s16 = sadd.s32 1, %s647_s13  ;;  %s31_s17 = sadd.s32 1, %s651_s14  ;;  %s655_s15 = sphi %s684_s15, %s12_s15   ;;  %s651_s14 = sphi %s682_s14, %s833_s14   ;;  %s647_s13 = sphi %s680_s13, %s832_s13   ;;  %s643_s12 = sphi %s678_s12, %s831_s12   ;;  %s639_s11 = sphi %s676_s11, %s830_s11   ;;  %s635_s10 = sphi %s674_s10, %s829_s10   ;;  %s631_s9 = sphi %s672_s9, %s828_s9  }
   0x5   : > { %p29_p0 = scmp.ge.s32.totalorder %s27_s16, 2  ;;  %s460_s18 = sadd.s32 4294967295, %s655_s15  }
   0x6   : > { %p101_p1 = scmp.ne.s32.totalorder %s635_s10, %s631_s9  ;;  %p102_p2 = scmp.eq.s32.totalorder %s460_s18, 3 }
   0x7   : > { %s835_s16 = smov (%p29_p0, %s27_s16), 0  ;;  %s837_s17 = smov (!%p29_p0, %s31_s17), %s651_s14 }
   0x8   : > { %s87_s19 = ssub.s32 %s647_s13, %s835_s16  ;;  %p33_p3 = scmp.ge.s32.totalorder %s837_s17, 2 }
   0x9   : > { %p464_p4 = scmp.ge.s32.totalorder %s655_s15, 1  ;;  %p718_p5 = por %p102_p2, %p101_p1 }
   0xa   : > { %p145_p6 = scmp.lt.s32.totalorder %s655_s15, 5  ;;  %s839_s17 = smov (%p33_p3, %s837_s17), 0 }
   0xb   : > { %s86_s21 = ssub.s32 %s651_s14, %s839_s17  ;;  %s91_s23 = sadd.s32 1, %s635_s10 }
   0xc   : > { %p146_p7 = pnand %p464_p4, %p145_p6  ;;  %s88_s22 = sor.u32 %s87_s19, %s86_s21 }
   0xd   : > { %p89_p8 = scmp.eq.s32.totalorder %s88_s22, 0  ;;  %s466_s25 = sshll.u32 (!%p146_p7), %s639_s11, 4 }
   0xe   : > { %149 = sbr.rel (%p146_p7) target bundleno = 294 (0x126), region = 28  ;;  %p174_p9 = scmp.lt.s32.totalorder (!%p146_p7), %s643_s12, 1 }
   0xf   : > { %s729_s24 = scalar_select %p89_p8, %s635_s10, %s91_s23  }
  0x10   : > { %p176_p10 = scmp.lt.s32.totalorder (!%p146_p7), %s466_s25, 31  ;;  %s170_s18 = sand.u32 (!%p146_p7), 1, %s631_s9  }
  0x11   : > { %s465_s19 = sshll.u32 (!%p146_p7), %s170_s18, 4 }
  0x12   : > { %s172_s21 = scalar_lea.vmem (!%p146_p7), [#allocation2], %s465_s19 }
  0x13   : > { %vm204_vm0 = vcmask 326656   ;;  %v186_v0 = vld [vmem:[%s825_s1] sm:$0xff]  ;;  %s175_s28 = scalar_select %p174_p9, %s643_s12, 1  ;;  %v187_v17 = vld [vmem:[%s825_s1 + $0x8] sm:$0xff] }
  0x14   : > { %542 = vmatprep.mubr.msk.f32.mxu0 %vm204_vm0, %v186_v0  ;;  %s841_s25 = smov (!%p176_p10, %s466_s25), 31  ;;  %s488_s22 = sshll.u32 (%p718_p5), %s643_s12, 2 }
  0x15   : > { %s467_s29 = sshll.u32 %s175_s28, 5  ;;  %s344_s23 = sadd.s32 (%p718_p5), %s639_s11, %s488_s22 }
  0x16   : > { %s182_s30 = sadd.s32 %s467_s29, %s841_s25  ;;  %s489_s25 = sshll.u32 (%p718_p5), %s344_s23, 3 }
  0x17   : > { %s468_s3 = sshll.u32 %s182_s30, 3  ;;  %s346_s9 = scalar_lea.vmem (%p718_p5), %s826_s2, %s489_s25 }
  0x18   : > { %s741_s6 = scalar_lea.vmem %s824_s0, %s468_s3 }
  0x19   : > { %v203_v1 = vld [vmem:[%s741_s6 + $0x78] sm:$0xff]  ;;  %v202_v2 = vld [vmem:[%s741_s6 + $0x70] sm:$0xff]  ;;  %v201_v3 = vld [vmem:[%s741_s6 + $0x68] sm:$0xff] }
  0x1a   : > { %510 = vmatprep.subr.msk.mxu0 %vm204_vm0, %v203_v1  ;;  %v200_v4 = vld [vmem:[%s741_s6 + $0x60] sm:$0xff]  ;;  %v199_v5 = vld [vmem:[%s741_s6 + $0x58] sm:$0xff]  ;;  %v198_v6 = vld [vmem:[%s741_s6 + $0x50] sm:$0xff] }
  0x1b   : > { %511 = vmatpush3.xpose.msk.msra.mxu0 %vm204_vm0, %v203_v1  ;;  %v197_v7 = vld [vmem:[%s741_s6 + $0x48] sm:$0xff]  ;;  %v196_v8 = vld [vmem:[%s741_s6 + $0x40] sm:$0xff]  ;;  %v195_v9 = vld [vmem:[%s741_s6 + $0x38] sm:$0xff] }
  0x1c   : > { %512 = vmatprep.subr.msk.mxu0 %vm204_vm0, %v202_v2  ;;  %v194_v10 = vld [vmem:[%s741_s6 + $0x30] sm:$0xff]  ;;  %v193_v11 = vld [vmem:[%s741_s6 + $0x28] sm:$0xff]  ;;  %v192_v12 = vld [vmem:[%s741_s6 + $0x20] sm:$0xff] }
  0x1d   : > { %v191_v13 = vld [vmem:[%s741_s6 + $0x18] sm:$0xff]  ;;  %v190_v14 = vld [vmem:[%s741_s6 + $0x10] sm:$0xff]  ;;  %v189_v15 = vld [vmem:[%s741_s6 + $0x8] sm:$0xff] }
  0x1e   : > { %v188_v16 = vld [vmem:[%s741_s6] sm:$0xff] }
  0x1f   : > { %513 = vmatpush3.xpose.msk.msra.mxu0 %vm204_vm0, %v202_v2 }
  0x20   : > { %514 = vmatprep.subr.msk.mxu0 %vm204_vm0, %v201_v3 }
  0x23   : > { %515 = vmatpush3.xpose.msk.msra.mxu0 %vm204_vm0, %v201_v3 }
  0x24   : > { %516 = vmatprep.subr.msk.mxu0 %vm204_vm0, %v200_v4 }
  0x27   : > { %517 = vmatpush3.xpose.msk.msra.mxu0 %vm204_vm0, %v200_v4 }
  0x28   : > { %518 = vmatprep.subr.msk.mxu0 %vm204_vm0, %v199_v5 }
  0x2b   : > { %519 = vmatpush3.xpose.msk.msra.mxu0 %vm204_vm0, %v199_v5 }
  0x2c   : > { %520 = vmatprep.subr.msk.mxu0 %vm204_vm0, %v198_v6 }
  0x2f   : > { %521 = vmatpush3.xpose.msk.msra.mxu0 %vm204_vm0, %v198_v6 }
  0x30   : > { %522 = vmatprep.subr.msk.mxu0 %vm204_vm0, %v197_v7 }
  0x33   : > { %523 = vmatpush3.xpose.msk.msra.mxu0 %vm204_vm0, %v197_v7 }
  0x34   : > { %524 = vmatprep.subr.msk.mxu0 %vm204_vm0, %v196_v8 }
  0x37   : > { %525 = vmatpush3.xpose.msk.msra.mxu0 %vm204_vm0, %v196_v8 }
  0x38   : > { %526 = vmatprep.subr.msk.mxu0 %vm204_vm0, %v195_v9 }
  0x3b   : > { %527 = vmatpush3.xpose.msk.msra.mxu0 %vm204_vm0, %v195_v9 }
  0x3c   : > { %528 = vmatprep.subr.msk.mxu0 %vm204_vm0, %v194_v10 }
  0x3f   : > { %529 = vmatpush3.xpose.msk.msra.mxu0 %vm204_vm0, %v194_v10 }
  0x40   : > { %530 = vmatprep.subr.msk.mxu0 %vm204_vm0, %v193_v11 }
  0x43   : > { %531 = vmatpush3.xpose.msk.msra.mxu0 %vm204_vm0, %v193_v11 }
  0x44   : > { %532 = vmatprep.subr.msk.mxu0 %vm204_vm0, %v192_v12 }
  0x47   : > { %533 = vmatpush3.xpose.msk.msra.mxu0 %vm204_vm0, %v192_v12 }
  0x48   : > { %534 = vmatprep.subr.msk.mxu0 %vm204_vm0, %v191_v13 }
  0x4b   : > { %535 = vmatpush3.xpose.msk.msra.mxu0 %vm204_vm0, %v191_v13 }
  0x4c   : > { %536 = vmatprep.subr.msk.mxu0 %vm204_vm0, %v190_v14 }
  0x4f   : > { %537 = vmatpush3.xpose.msk.msra.mxu0 %vm204_vm0, %v190_v14 }
  0x50   : > { %538 = vmatprep.subr.msk.mxu0 %vm204_vm0, %v189_v15 }
  0x53   : > { %539 = vmatpush3.xpose.msk.msra.mxu0 %vm204_vm0, %v189_v15 }
  0x54   : > { %540 = vmatprep.subr.msk.mxu0 %vm204_vm0, %v188_v16 }
  0x57   : > { %541 = vmatpush3.xpose.msk.msra.mxu0 %vm204_vm0, %v188_v16 }
  0x5a   : > { %543 = vmatmul.mubr.msk.f32.vlgmr.msra.gmra.mxu0 %vm204_vm0, %v187_v17 }
 0x119   : > { %342 = sbr.rel (!%p718_p5) target bundleno = 294 (0x126), region = 32 }
 0x11a   : > { %v544_v18 = vpop.f32.mrf.mxu0 }
 0x11b   : > { %335 = vst [vmem:[%s172_s21 + $0x8] sm:$0xf] %v544_v18 }
 0x11c   : > { %v325_v19 = vpop.f32.mrf.mxu0 }
 0x11d   : > { %334 = vst [vmem:[%s172_s21] sm:$0xff] %v325_v19 }
 0x122   : > { %v379_v21 = vld [vmem:[%s172_s21 + $0x8] sm:$0xff] }
 0x123   : > { %380 = vst [vmem:[%s346_s9 + $0x10] sm:$0xff] %v379_v21 }
 0x124   : > { %v377_v20 = vld [vmem:[%s172_s21] sm:$0xff] }
 0x125   : > { %378 = vst [vmem:[%s346_s9] sm:$0xff] %v377_v20 }
 0x126 PF: > { %s12_s15 = sadd.s32 1, %s655_s15   ;;  %s828_s9 = smov %s635_s10 }
 0x127   : > { %p9_p11 = scmp.ge.s32.totalorder %s12_s15, 6   ;;  %s829_s10 = smov %s729_s24 }
 0x128   : > { %s830_s11 = smov %s647_s13  ;;  %s831_s12 = smov %s651_s14 }
 0x129   : > { %s832_s13 = smov %s835_s16  ;;  %s833_s14 = smov %s839_s17 }
 0x12a   :  { %11 = sbr.rel (!%p9_p11) target bundleno = 4 (0x4), region = 96 }

</bundles_post_ra>
